<compile_context>
chip_gen: v5e
topology: v5e:2x2
jax: 0.10.0
libtpu: 0.0.40
codegen_flags: <defaults>
</compile_context>

<pallas_src>
import jax
import jax.numpy as jnp
import numpy as np
from jax.experimental import pallas as pl
from jax.experimental.pallas import tpu as pltpu


def glu_kernel(x_ref, w1_ref, b1_ref, w2_ref, b2_ref, o_ref, xn_ref):
    """One (tm, tn) output tile: LayerNorm (affine pre-folded) -> values * sigmoid(gates)."""
    # LayerNorm once per row tile (column tile j == 0); cached in VMEM scratch and
    # reused across all column tiles of this row tile.
    @pl.when(pl.program_id(1) == 0)
    def _():
        x = x_ref[...].astype(jnp.float32)
        # One-pass moments: the two reductions are independent (overlap on the XLU);
        # keep f32 and clamp var >= 0 against cancellation.  eps = 1e-5 (PyTorch).
        mean = jnp.mean(x, axis=-1, keepdims=True)
        mean_sq = jnp.mean(x * x, axis=-1, keepdims=True)
        var = jnp.maximum(mean_sq - mean * mean, 0.0)
        xn_ref[...] = ((x - mean) * jax.lax.rsqrt(var + 1e-5)).astype(xn_ref.dtype)

    xn = xn_ref[...]
    values = jnp.dot(xn, w1_ref[...], preferred_element_type=jnp.float32)
    values = values + b1_ref[...].astype(jnp.float32)
    gates = jnp.dot(xn, w2_ref[...], preferred_element_type=jnp.float32)
    gates = jax.nn.sigmoid(gates + b2_ref[...].astype(jnp.float32))  # EUP, f32
    o_ref[...] = (values * gates).astype(o_ref.dtype)


def _round_up(n, m):
    return ((n + m - 1) // m) * m


def _vmem_limit_bytes():
    """Generation-aware scoped-VMEM limit: ~75% of physical per-core VMEM.

    v7x (64 MiB) -> ~48 MiB, v6e/v5e (128 MiB) -> ~96 MiB; leaves headroom for
    Mosaic internal scratch / semaphores.
    """
    try:
        cap = int(pltpu.get_tpu_info().vmem_capacity_bytes)
    except Exception:
        cap = 64 * 1024 * 1024  # conservative fallback (v7x per-core)
    return (cap * 3) // 4


def _pick_col_tiles(E, w_itemsize, budget):
    """Number of output-column tiles so the weight blocks fit the VMEM budget."""
    # Fully resident (single-buffered) weights if both fit in half the budget.
    if 2 * E * E * w_itemsize <= budget // 2:
        return 1
    nj = 1
    while True:
        nxt = nj * 2
        tn = E // nxt
        if E % nxt != 0 or tn % 128 != 0 or tn < 256:
            break
        nj = nxt
        # Streamed weights are double-buffered: 2 bufs x 2 weights x (E, tn).
        if 4 * E * (E // nj) * w_itemsize <= budget // 2:
            break
    return nj


def _pick_tm(tm_req, N, E, tn, nj, x_itemsize, w_itemsize, out_itemsize, budget):
    """Clamp the row tile to the problem size and the VMEM budget (actual dtypes)."""
    tm = max(8, _round_up(min(tm_req, _round_up(N, 8)), 8))
    # Keep >= ~8 row-grid steps on larger problems so both v7x TensorCores get
    # pipelined work (2 steps would leave each core one un-overlapped step).
    if N > 256:
        tm = min(tm, max(128, _round_up(pl.cdiv(N, 8), 8)))

    if nj == 1:
        # Grid-invariant weights: single-buffered (pl.Buffered(1)).
        w_bytes = 2 * E * E * w_itemsize + 2 * E * 4
    else:
        # Streamed column tiles: double-buffered weight + bias blocks.
        w_bytes = 2 * (2 * E * tn * w_itemsize + 2 * tn * 4)

    # Per-row VMEM: x tile (2x buffered, real dtype) + out tile (2x buffered)
    # + xn scratch (compute dtype) + f32 temps (x copy, values, gates).
    per_row = (2 * E * x_itemsize
               + 2 * tn * out_itemsize
               + E * w_itemsize
               + (E + 2 * tn) * 4)

    while tm > 8 and w_bytes + tm * per_row > budget:
        tm -= 8
    if w_bytes + tm * per_row > budget:
        raise ValueError(
            f"GLU kernel: weight blocks for E={E} (tn={tn}, nj={nj}) exceed the "
            f"VMEM budget of {budget} bytes on this device.")
    return tm


def prepare_glu_params(gamma, beta, w1, b1, w2, b2, *, compute_dtype=jnp.bfloat16):
    """One-time (outside the hot path) folding of LayerNorm affine into the linears.

    w1, w2: [E, E] PyTorch (out, in) layout; b1, b2, gamma, beta: [E].
      (ln(x) * gamma + beta) @ W^T + b == ln(x) @ (gamma[:, None] * W^T) + (beta @ W^T + b)
    Returns (w1f, b1f, w2f, b2f): weights [E, E] in (in, out) layout and
    `compute_dtype`; biases [1, E] kept in f32.
    """
    E = gamma.shape[0]
    g = gamma.astype(jnp.float32)[:, None]
    bt = beta.astype(jnp.float32)
    w1t = w1.T.astype(jnp.float32)
    w2t = w2.T.astype(jnp.float32)
    w1f = (g * w1t).astype(compute_dtype)
    w2f = (g * w2t).astype(compute_dtype)
    b1f = (bt @ w1t + b1.astype(jnp.float32)).reshape(1, E)
    b2f = (bt @ w2t + b2.astype(jnp.float32)).reshape(1, E)
    return w1f, b1f, w2f, b2f


def glu_forward(x, w1f, b1f, w2f, b2f, *, tm=512, out_dtype=None):
    """x: [B, S, E]; params as produced by prepare_glu_params."""
    B, S, E = x.shape
    N = B * S
    out_dtype = x.dtype if out_dtype is None else out_dtype

    x_item = jnp.dtype(x.dtype).itemsize
    w_item = jnp.dtype(w1f.dtype).itemsize
    o_item = jnp.dtype(out_dtype).itemsize

    vmem_limit = _vmem_limit_bytes()
    budget = vmem_limit - 4 * 1024 * 1024  # margin for Mosaic internal scratch
    nj = _pick_col_tiles(E, w_item, budget)
    tn = E // nj
    tm = _pick_tm(tm, N, E, tn, nj, x_item, w_item, o_item, budget)

    x2 = x.reshape(N, E)  # metadata-only reshape; no pad / slice HBM round-trip

    if nj == 1:
        # Grid-invariant blocks: single-buffer them (no next block to prefetch).
        w_spec = pl.BlockSpec((E, tn), lambda i, j: (0, j), pipeline_mode=pl.Buffered(1))
        b_spec = pl.BlockSpec((1, tn), lambda i, j: (0, j), pipeline_mode=pl.Buffered(1))
    else:
        w_spec = pl.BlockSpec((E, tn), lambda i, j: (0, j))
        b_spec = pl.BlockSpec((1, tn), lambda i, j: (0, j))

    out2 = pl.pallas_call(
        glu_kernel,
        out_shape=jax.ShapeDtypeStruct((N, E), out_dtype),
        grid_spec=pltpu.PrefetchScalarGridSpec(
            num_scalar_prefetch=0,
            grid=(pl.cdiv(N, tm), nj),
            in_specs=[
                pl.BlockSpec((tm, E), lambda i, j: (i, 0)),  # x row tile
                w_spec, b_spec,                              # glu_ff1 (gamma folded)
                w_spec, b_spec,                              # glu_ff2 (gamma folded)
            ],
            out_specs=pl.BlockSpec((tm, tn), lambda i, j: (i, j)),
            scratch_shapes=[pltpu.VMEM((tm, E), w1f.dtype)],  # normalized-x cache
        ),
        compiler_params=pltpu.CompilerParams(
            dimension_semantics=("parallel", "arbitrary"),
            vmem_limit_bytes=vmem_limit,
        ),
    )(x2, w1f, b1f, w2f, b2f)

    return out2.reshape(B, S, E)


def glu_reference(x, gamma, beta, w1, b1, w2, b2):
    """Pure-JAX reference matching the PyTorch module semantics."""
    mean = jnp.mean(x, axis=-1, keepdims=True)
    var = jnp.mean(jnp.square(x - mean), axis=-1, keepdims=True)
    xn = (x - mean) * jax.lax.rsqrt(var + 1e-5) * gamma + beta
    values = xn @ w1.T + b1
    gates = jax.nn.sigmoid(xn @ w2.T + b2)
    return values * gates


if __name__ == "__main__":
    # S = 7 -> N = 14 (not a multiple of 8): exercises the masked partial last block.
    B, S, E = 2, 7, 32
    key = jax.random.PRNGKey(0)
    kx, kg, kb, kw1, kb1, kw2, kb2 = jax.random.split(key, 7)

    x = jax.random.normal(kx, (B, S, E), dtype=jnp.float32)

    # Non-trivial LayerNorm affine to exercise the gamma/beta folding.
    gamma = 1.0 + 0.1 * jax.random.normal(kg, (E,), dtype=jnp.float32)
    beta = 0.1 * jax.random.normal(kb, (E,), dtype=jnp.float32)
    # Linear layers: uniform(-1/sqrt(E), 1/sqrt(E)) like PyTorch's default.
    bound = 1.0 / np.sqrt(E)
    w1 = jax.random.uniform(kw1, (E, E), jnp.float32, -bound, bound)
    b1 = jax.random.uniform(kb1, (E,), jnp.float32, -bound, bound)
    w2 = jax.random.uniform(kw2, (E, E), jnp.float32, -bound, bound)
    b2 = jax.random.uniform(kb2, (E,), jnp.float32, -bound, bound)

    ref = glu_reference(x, gamma, beta, w1, b1, w2, b2)

    # f32 path: matches the reference to ~1e-5 (one-pass moments + folded affine).
    params_f32 = prepare_glu_params(gamma, beta, w1, b1, w2, b2,
                                    compute_dtype=jnp.float32)
    out_f32 = jax.block_until_ready(glu_forward(x, *params_f32))
    np.testing.assert_allclose(np.asarray(out_f32), np.asarray(ref),
                               rtol=2e-4, atol=2e-4)

    # bf16 weights + bf16 activations/output (production default): looser tolerance.
    params_bf16 = prepare_glu_params(gamma, beta, w1, b1, w2, b2,
                                     compute_dtype=jnp.bfloat16)
    out_bf16 = jax.block_until_ready(
        glu_forward(x.astype(jnp.bfloat16), *params_bf16, out_dtype=jnp.bfloat16))
    np.testing.assert_allclose(np.asarray(out_bf16, dtype=np.float32),
                               np.asarray(ref), rtol=5e-2, atol=5e-2)

    print("KERNEL_OK")
</pallas_src>

<mosaic_0001>
module attributes {stable_mosaic.version = 11 : i64} {
  func.func @glu_kernel(%arg0: i32, %arg1: i32, %arg2: memref<16x32xf32, #tpu.memory_space<vmem>>, %arg3: memref<32x32xf32, #tpu.memory_space<vmem>>, %arg4: memref<1x32xf32, #tpu.memory_space<vmem>>, %arg5: memref<32x32xf32, #tpu.memory_space<vmem>>, %arg6: memref<1x32xf32, #tpu.memory_space<vmem>>, %arg7: memref<16x32xf32, #tpu.memory_space<vmem>>, %arg8: memref<16x32xf32, #tpu.memory_space<vmem>>) attributes {dimension_semantics = [#tpu.dimension_semantics<parallel>, #tpu.dimension_semantics<arbitrary>], iteration_bounds = array<i64: 1, 1>, scalar_prefetch = 0 : i64, scratch_operands = 1 : i64, tpu.core_type = #tpu.core_type<tc>, window_params = [{transform_indices = @transform_0, window_bounds = array<i64: 16, 32>}, {pipeline_mode = #tpu.pipeline_mode<synchronous>, transform_indices = @transform_1, window_bounds = array<i64: 32, 32>}, {pipeline_mode = #tpu.pipeline_mode<synchronous>, transform_indices = @transform_2, window_bounds = array<i64: 1, 32>}, {pipeline_mode = #tpu.pipeline_mode<synchronous>, transform_indices = @transform_3, window_bounds = array<i64: 32, 32>}, {pipeline_mode = #tpu.pipeline_mode<synchronous>, transform_indices = @transform_4, window_bounds = array<i64: 1, 32>}, {transform_indices = @transform_5, window_bounds = array<i64: 16, 32>}]} {
    %c0_i32 = arith.constant 0 : i32
    %0 = arith.cmpi eq, %arg1, %c0_i32 : i32
    %1 = arith.extui %0 : i1 to i32
    %c0_i32_0 = arith.constant 0 : i32
    %2 = arith.cmpi ne, %1, %c0_i32_0 : i32
    scf.if %2 {
      %c0_14 = arith.constant 0 : index
      %c0_15 = arith.constant 0 : index
      %21 = vector.load %arg2[%c0_14, %c0_15] : memref<16x32xf32, #tpu.memory_space<vmem>>, vector<16x32xf32>
      %cst_16 = arith.constant dense<0.000000e+00> : vector<16xf32>
      %22 = vector.multi_reduction <add>, %21, %cst_16 [1] : vector<16x32xf32> to vector<16xf32>
      %23 = vector.shape_cast %22 : vector<16xf32> to vector<16x1xf32>
      %cst_17 = arith.constant 3.200000e+01 : f32
      %24 = vector.broadcast %cst_17 : f32 to vector<16x1xf32>
      %25 = arith.divf %23, %24 : vector<16x1xf32>
      %26 = arith.mulf %21, %21 : vector<16x32xf32>
      %cst_18 = arith.constant dense<0.000000e+00> : vector<16xf32>
      %27 = vector.multi_reduction <add>, %26, %cst_18 [1] : vector<16x32xf32> to vector<16xf32>
      %28 = vector.shape_cast %27 : vector<16xf32> to vector<16x1xf32>
      %cst_19 = arith.constant 3.200000e+01 : f32
      %29 = vector.broadcast %cst_19 : f32 to vector<16x1xf32>
      %30 = arith.divf %28, %29 : vector<16x1xf32>
      %31 = arith.mulf %25, %25 : vector<16x1xf32>
      %32 = arith.subf %30, %31 : vector<16x1xf32>
      %cst_20 = arith.constant 0.000000e+00 : f32
      %33 = vector.broadcast %cst_20 : f32 to vector<16x1xf32>
      %34 = arith.maximumf %32, %33 : vector<16x1xf32>
      %35 = vector.broadcast %25 : vector<16x1xf32> to vector<16x32xf32>
      %36 = arith.subf %21, %35 : vector<16x32xf32>
      %cst_21 = arith.constant 9.99999974E-6 : f32
      %37 = vector.broadcast %cst_21 : f32 to vector<16x1xf32>
      %38 = arith.addf %34, %37 : vector<16x1xf32>
      %39 = math.rsqrt %38 : vector<16x1xf32>
      %40 = vector.broadcast %39 : vector<16x1xf32> to vector<16x32xf32>
      %41 = arith.mulf %36, %40 : vector<16x32xf32>
      %c0_22 = arith.constant 0 : index
      %c0_23 = arith.constant 0 : index
      %42 = vector.load %arg8[%c0_22, %c0_23] : memref<16x32xf32, #tpu.memory_space<vmem>>, vector<16x32xf32>
      tpu.vector_store %arg8[%c0_22, %c0_23], %41 {strides = array<i32>} : memref<16x32xf32, #tpu.memory_space<vmem>>, vector<16x32xf32>,
    } else {
    }
    %c0 = arith.constant 0 : index
    %c0_1 = arith.constant 0 : index
    %3 = vector.load %arg8[%c0, %c0_1] : memref<16x32xf32, #tpu.memory_space<vmem>>, vector<16x32xf32>
    %c0_2 = arith.constant 0 : index
    %c0_3 = arith.constant 0 : index
    %4 = vector.load %arg3[%c0_2, %c0_3] : memref<32x32xf32, #tpu.memory_space<vmem>>, vector<32x32xf32>
    %cst = arith.constant dense<0.000000e+00> : vector<16x32xf32>
    %5 = tpu.matmul %3, %4, %cst {dimension_numbers = #tpu.dot_dimension_numbers<[1], [0], [0], [1], [0, 0, 1, 1], [], []>} : vector<16x32xf32>, vector<32x32xf32>, vector<16x32xf32> -> vector<16x32xf32>
    %c0_4 = arith.constant 0 : index
    %c0_5 = arith.constant 0 : index
    %6 = vector.load %arg4[%c0_4, %c0_5] : memref<1x32xf32, #tpu.memory_space<vmem>>, vector<1x32xf32>
    %7 = vector.broadcast %6 : vector<1x32xf32> to vector<16x32xf32>
    %8 = arith.addf %5, %7 : vector<16x32xf32>
    %c0_6 = arith.constant 0 : index
    %c0_7 = arith.constant 0 : index
    %9 = vector.load %arg5[%c0_6, %c0_7] : memref<32x32xf32, #tpu.memory_space<vmem>>, vector<32x32xf32>
    %cst_8 = arith.constant dense<0.000000e+00> : vector<16x32xf32>
    %10 = tpu.matmul %3, %9, %cst_8 {dimension_numbers = #tpu.dot_dimension_numbers<[1], [0], [0], [1], [0, 0, 1, 1], [], []>} : vector<16x32xf32>, vector<32x32xf32>, vector<16x32xf32> -> vector<16x32xf32>
    %c0_9 = arith.constant 0 : index
    %c0_10 = arith.constant 0 : index
    %11 = vector.load %arg6[%c0_9, %c0_10] : memref<1x32xf32, #tpu.memory_space<vmem>>, vector<1x32xf32>
    %12 = vector.broadcast %11 : vector<1x32xf32> to vector<16x32xf32>
    %13 = arith.addf %10, %12 : vector<16x32xf32>
    %14 = arith.negf %13 : vector<16x32xf32>
    %15 = math.exp %14 : vector<16x32xf32>
    %cst_11 = arith.constant 1.000000e+00 : f32
    %16 = vector.broadcast %cst_11 : f32 to vector<16x32xf32>
    %17 = arith.addf %16, %15 : vector<16x32xf32>
    %18 = arith.divf %16, %17 : vector<16x32xf32>
    %19 = arith.mulf %8, %18 : vector<16x32xf32>
    %c0_12 = arith.constant 0 : index
    %c0_13 = arith.constant 0 : index
    %20 = vector.load %arg7[%c0_12, %c0_13] : memref<16x32xf32, #tpu.memory_space<vmem>>, vector<16x32xf32>
    tpu.vector_store %arg7[%c0_12, %c0_13], %19 {strides = array<i32>} : memref<16x32xf32, #tpu.memory_space<vmem>>, vector<16x32xf32>,
    return
  }
  func.func @transform_0(%arg0: i32, %arg1: i32) -> (i32, i32) {
    %c0_i32 = arith.constant 0 : i32
    %c0_i32_0 = arith.constant 0 : i32
    return %arg0, %c0_i32 : i32, i32
  }
  func.func @transform_1(%arg0: i32, %arg1: i32) -> (i32, i32) {
    %c0_i32 = arith.constant 0 : i32
    %c0_i32_0 = arith.constant 0 : i32
    return %c0_i32, %arg1 : i32, i32
  }
  func.func @transform_2(%arg0: i32, %arg1: i32) -> (i32, i32) {
    %c0_i32 = arith.constant 0 : i32
    %c0_i32_0 = arith.constant 0 : i32
    return %c0_i32, %arg1 : i32, i32
  }
  func.func @transform_3(%arg0: i32, %arg1: i32) -> (i32, i32) {
    %c0_i32 = arith.constant 0 : i32
    %c0_i32_0 = arith.constant 0 : i32
    return %c0_i32, %arg1 : i32, i32
  }
  func.func @transform_4(%arg0: i32, %arg1: i32) -> (i32, i32) {
    %c0_i32 = arith.constant 0 : i32
    %c0_i32_0 = arith.constant 0 : i32
    return %c0_i32, %arg1 : i32, i32
  }
  func.func @transform_5(%arg0: i32, %arg1: i32) -> (i32, i32) {
    %c0_i32 = arith.constant 0 : i32
    return %arg0, %arg1 : i32, i32
  }
}

</mosaic_0001>

<bundles_post_ra>
// kernel: tpu_custom_call.1
= control target key start
LH: loop header
LB: loop body
LE: loop exit
PB: predicated region body
PF: predicated region fallthrough
CT: control target
= control target key end

     0   :  { %10 = vsyncpa [#allocation4], 0  ;;  %s502_s0 = inlined_call_operand.hbm [shape: f32[14,32], index: 0, kind: input, shape index: {}]   ;;  %s503_s1 = inlined_call_operand.hbm [shape: f32[32,32], index: 1, kind: input, shape index: {}]   ;;  %s504_s2 = inlined_call_operand.vmem [shape: f32[1,32], index: 2, kind: input, shape index: {}]   ;;  %s505_s3 = inlined_call_operand.hbm [shape: f32[32,32], index: 3, kind: input, shape index: {}]   ;;  %s506_s4 = inlined_call_operand.vmem [shape: f32[1,32], index: 4, kind: input, shape index: {}]   ;;  %s507_s5 = inlined_call_operand.hbm [shape: f32[14,32], index: 5, kind: output, shape index: {}]  }
   0x1   :  { %11 = vsyncpa [#allocation7], 0 }
   0x2   :  { %12 = vsyncpa [#allocation5], 0  ;;  %s30_s20 = sshll.u32 %s503_s1, 4  ;;  %s406_s21 = smov [#allocation6]   ;;  %s31_s20 = int_to_ptr.hbm [resolvable:$true] %s30_s20 }
   0x3   :  { %s32_s22 = sshll.u32 %s406_s21, 4  ;;  %s17_s25 = sshll.u32 %s502_s0, 4  ;;  %s33_s22 = int_to_ptr.vmem [resolvable:$true] %s32_s22  ;;  %s18_s25 = int_to_ptr.hbm [resolvable:$true] %s17_s25 }
   0x4   :  { %s407_s26 = smov 128   ;;  %s408_s27 = smov 8  }
   0x5   :  { %38 = dma.hbm_to_vmem [thread:$0]  %s31_s20, 512, %s33_s22, [#allocation7], %s407_s26, %s407_s26, %s408_s27  }
   0x6   :  { %s409_s28 = smov [#allocation3]   ;;  %s45_s1 = sshll.u32 %s505_s3, 4  ;;  %s46_s1 = int_to_ptr.hbm [resolvable:$true] %s45_s1 }
   0x7   :  { %s19_s29 = sshll.u32 %s409_s28, 4  ;;  %s410_s0 = smov [#allocation8]   ;;  %s20_s29 = int_to_ptr.vmem [resolvable:$true] %s19_s29 }
   0x8   :  { %25 = dma.hbm_to_vmem [thread:$0]  %s18_s25, 256, %s20_s29, [#allocation4], %s407_s26, %s407_s26, %s408_s27  }
   0x9   :  { %s47_s7 = sshll.u32 %s410_s0, 4  ;;  %s48_s7 = int_to_ptr.vmem [resolvable:$true] %s47_s7 }
   0xa   :  { %53 = dma.hbm_to_vmem [thread:$0]  %s46_s1, 512, %s48_s7, [#allocation7], %s407_s26, %s407_s26, %s408_s27  }
   0xb   :  { %400 = dma.done.wait [#allocation4], 256  }
   0xc   :  { %401 = vsyncadd [#allocation4], 4294967040 }
   0xd   :  { %402 = dma.done.wait [#allocation7], 1024  }
   0xe   :  { %403 = vsyncadd [#allocation7], 4294966272  ;;  %vm74_vm0 = vcmask 261120   ;;  %v461_v0 = vld [vmem:[#allocation3 + $0x8] sm:$0xff]  ;;  %v463_v1 = vld [vmem:[#allocation3] sm:$0xff]  ;;  %v411_v8 = vmov 32.0  }
   0xf   :  { %v78_v2 = vsel %vm74_vm0, %v461_v0, 0.0  ;;  %v75_v3 = vsel %vm74_vm0, %v463_v1, 0.0  ;;  %v91_v4 = vmul.f32 %v461_v0, %v461_v0  ;;  %v90_v5 = vmul.f32 %v463_v1, %v463_v1  ;;  %v139_v19 = vld [vmem:[#allocation6 + $0x18] sm:$0xff]  ;;  %v138_v21 = vld [vmem:[#allocation6 + $0x10] sm:$0xff]  ;;  %v137_v26 = vld [vmem:[#allocation6 + $0x8] sm:$0xff]  ;;  %s253_s13 = sshll.u32 %s507_s5, 4  ;;  %s254_s13 = int_to_ptr.hbm [resolvable:$true] %s253_s13 }
  0x10   :  { %79 = vadd.xlane.f32.xlu0 %v78_v2  ;;  %76 = vadd.xlane.f32.xlu1 %v75_v3  ;;  %290 = vrcp.f32 %v411_v8  ;;  %v177_v20 = vld [vmem:[#allocation8 + $0x18] sm:$0xff]  ;;  %v176_v23 = vld [vmem:[#allocation8 + $0x10] sm:$0xff]  ;;  %v175_v30 = vld [vmem:[#allocation8 + $0x8] sm:$0xff] }
  0x11   :  { %v95_v6 = vsel %vm74_vm0, %v91_v4, 0.0  ;;  %v92_v7 = vsel %vm74_vm0, %v90_v5, 0.0  ;;  %163 = vmatpush.msra.mxu0 %v139_v19  ;;  %273 = vmatpush.msra.mxu2 %v139_v19  ;;  %v136_v31 = vld [vmem:[#allocation6] sm:$0xff] }
  0x12   :  { %194 = vmatpush.msra.mxu1 %v177_v20  ;;  %277 = vmatpush.msra.mxu3 %v177_v20  ;;  %v174_v34 = vld [vmem:[#allocation8] sm:$0xff] }
  0x13   :  { %164 = vmatpush.msra.mxu0 %v138_v21  ;;  %274 = vmatpush.msra.mxu2 %v138_v21  ;;  %v289_v59 = vld [vmem:[%s506_s4] ss:$0 sm:$0xff] }
  0x14   :  { %195 = vmatpush.msra.mxu1 %v176_v23  ;;  %278 = vmatpush.msra.mxu3 %v176_v23 }
  0x15   :  { %165 = vmatpush.msra.mxu0 %v137_v26  ;;  %275 = vmatpush.msra.mxu2 %v137_v26 }
  0x16   :  { %v291_v9 = vpop.eup %290  ;;  %196 = vmatpush.msra.mxu1 %v175_v30  ;;  %279 = vmatpush.msra.mxu3 %v175_v30 }
  0x17   :  { %v82_v10 = vmul.f32 32.0, %v291_v9  ;;  %vm86_vm1 = vweird.f32 %v291_v9  ;;  %166 = vmatpush.msra.mxu0 %v136_v31  ;;  %276 = vmatpush.msra.mxu2 %v136_v31 }
  0x18   :  { %96 = vadd.xlane.f32.xlu0 %v95_v6  ;;  %93 = vadd.xlane.f32.xlu1 %v92_v7 }
  0x19   :  { %v83_v11 = vsub.f32 1.0, %v82_v10  ;;  %197 = vmatpush.msra.mxu1 %v174_v34  ;;  %280 = vmatpush.msra.mxu3 %v174_v34 }
  0x1b   :  { %v84_v12 = vmul.f32 %v291_v9, %v83_v11  ;;  %v288_v11 = vld [vmem:[%s504_s2] ss:$0 sm:$0xff]  ;;  %s412_s2 = smov [#allocation9]  }
  0x1c   :  { %s251_s10 = sshll.u32 %s412_s2, 4  ;;  %s252_s10 = int_to_ptr.vmem [resolvable:$true] %s251_s10 }
  0x1d   :  { %v85_v13 = vadd.f32 %v291_v9, %v84_v12 }
  0x1f   :  { %v87_v16 = vsel %vm86_vm1, %v291_v9, %v85_v13 }
  0x83   :  { %v80_v14 = vpop.xlane.xlu0 %79  ;;  %v77_v15 = vpop.xlane.xlu1 %76 }
  0x84   :  { %v475_v17 = vmul.f32 %v87_v16, %v77_v15  ;;  %v89_v18 = vmul.f32 %v87_v16, %v80_v14 }
  0x86   :  { %v100_v22 = vmul.f32 %v475_v17, %v475_v17  ;;  %v101_v27 = vmul.f32 %v89_v18, %v89_v18  ;;  %v107_v50 = vsub.f32 %v461_v0, %v89_v18  ;;  %v106_v52 = vsub.f32 %v463_v1, %v475_v17 }
  0x8b   :  { %v97_v24 = vpop.xlane.xlu0 %96  ;;  %v94_v25 = vpop.xlane.xlu1 %93 }
  0x8c   :  { %v99_v28 = vmul.f32 %v97_v24, %v87_v16  ;;  %v98_v29 = vmul.f32 %v94_v25, %v87_v16 }
  0x8e   :  { %v103_v32 = vsub.f32 %v99_v28, %v101_v27  ;;  %v102_v33 = vsub.f32 %v98_v29, %v100_v22 }
  0x90   :  { %v105_v35 = vmax.f32 %v103_v32, 0.0  ;;  %v104_v36 = vmax.f32 %v102_v33, 0.0 }
  0x92   :  { %v109_v37 = vadd.f32 1e-05, %v105_v35  ;;  %v108_v38 = vadd.f32 1e-05, %v104_v36 }
  0x94   :  { %292 = vrsqrt.f32 %v109_v37  ;;  %vm126_vm4 = vweird.f32 %v109_v37  ;;  %vm116_vm6 = vweird.f32 %v108_v38 }
  0x95   :  { %294 = vrsqrt.f32 %v108_v38 }
  0x9a   :  { %v293_v39 = vpop.eup %292 }
  0x9b   :  { %v295_v40 = vpop.eup %294  ;;  %v121_v41 = vmul.f32 %v293_v39, %v109_v37  ;;  %vm127_vm2 = vweird.f32 %v293_v39 }
  0x9c   :  { %v111_v42 = vmul.f32 %v295_v40, %v108_v38  ;;  %vm117_vm3 = vweird.f32 %v295_v40  ;;  %vm128_vm5 = vmor %vm126_vm4, %vm127_vm2 }
  0x9d   :  { %v122_v43 = vmul.f32 %v293_v39, %v121_v41  ;;  %vm118_vm7 = vmor %vm116_vm6, %vm117_vm3 }
  0x9e   :  { %v112_v44 = vmul.f32 %v295_v40, %v111_v42 }
  0x9f   :  { %v123_v45 = vmul.f32 0.5, %v122_v43 }
  0xa0   :  { %v113_v46 = vmul.f32 0.5, %v112_v44 }
  0xa1   :  { %v124_v47 = vsub.f32 1.5, %v123_v45 }
  0xa2   :  { %v114_v48 = vsub.f32 1.5, %v113_v46 }
  0xa3   :  { %v125_v49 = vmul.f32 %v293_v39, %v124_v47 }
  0xa4   :  { %v115_v51 = vmul.f32 %v295_v40, %v114_v48 }
  0xa5   :  { %v129_v53 = vsel %vm128_vm5, %v293_v39, %v125_v49 }
  0xa6   :  { %v131_v54 = vmul.f32 %v129_v53, %v107_v50  ;;  %v119_v55 = vsel %vm118_vm7, %v295_v40, %v115_v51 }
  0xa7   :  { %v130_v56 = vmul.f32 %v119_v55, %v106_v52 }
  0xa8   :  { %133 = vst.msk [vmem:[#allocation2 + $0x8] sm:$0xff] %vm74_vm0, %v131_v54 }
  0xa9   :  { %132 = vst.msk [vmem:[#allocation2] sm:$0xff] %vm74_vm0, %v130_v56 }
  0xaf   :  { %v135_v57 = vld [vmem:[#allocation2 + $0x8] sm:$0xff] }
  0xb0   :  { %v134_v58 = vld [vmem:[#allocation2] sm:$0xff]  ;;  %268 = vmatmul.msk.f32.vlgmr.msra.gmra.mxu2 %vm74_vm0, %v135_v57  ;;  %270 = vmatmul.msk.f32.vlgmr.msra.gmra.mxu3 %vm74_vm0, %v135_v57 }
  0xb1   :  { %267 = vmatmul.msk.f32.vlgmr.msra.gmra.mxu0 %vm74_vm0, %v134_v58  ;;  %269 = vmatmul.msk.f32.vlgmr.msra.gmra.mxu1 %vm74_vm0, %v134_v58 }
 0x12e   :  { %v199_v60 = vpop.f32.mrf.mxu1  ;;  %v168_v14 = vpop.f32.mrf.mxu0 }
 0x12f   :  { %v200_v61 = vadd.f32 %v289_v59, %v199_v60  ;;  %v169_v19 = vadd.f32 %v288_v11, %v168_v14 }
 0x131   :  { %v271_v62 = vmul.f32 -1.442695, %v200_v61 }
 0x133   :  { %296 = vpow2.f32 %v271_v62  ;;  %v202_v63 = vpop.f32.mrf.mxu3  ;;  %v171_v25 = vpop.f32.mrf.mxu2 }
 0x134   :  { %v203_v0 = vadd.f32 %v289_v59, %v202_v63  ;;  %v172_v29 = vadd.f32 %v288_v11, %v171_v25 }
 0x136   :  { %v272_v1 = vmul.f32 -1.442695, %v203_v0 }
 0x138   :  { %298 = vpow2.f32 %v272_v1 }
 0x139   :  { %v297_v2 = vpop.eup %296 }
 0x13a   :  { %v211_v3 = vadd.f32 1.0, %v297_v2 }
 0x13c   :  { %300 = vrcp.f32 %v211_v3  ;;  %v224_v9 = vand.u32 2147483648, %v211_v3  ;;  %v222_v13 = vand.u32 2147483647, %v211_v3  ;;  %vm218_vm9 = vweird.f32 %v211_v3 }
 0x13e   :  { %v299_v4 = vpop.eup %298  ;;  %v225_v18 = vor.u32 1.1754944e-38, %v224_v9  ;;  %vm223_vm11 = vcmp.eq.f32.partialorder %v222_v13, 8.507059e+37 }
 0x13f   :  { %v212_v5 = vadd.f32 1.0, %v299_v4 }
 0x141   :  { %302 = vrcp.f32 %v212_v5  ;;  %v239_v20 = vand.u32 2147483648, %v212_v5  ;;  %v237_v24 = vand.u32 2147483647, %v212_v5  ;;  %vm233_vm13 = vweird.f32 %v212_v5 }
 0x142   :  { %v301_v6 = vpop.eup %300 }
 0x143   :  { %v214_v7 = vmul.f32 %v301_v6, %v211_v3  ;;  %vm219_vm8 = vweird.f32 %v301_v6  ;;  %v240_v28 = vor.u32 1.1754944e-38, %v239_v20  ;;  %vm238_vm15 = vcmp.eq.f32.partialorder %v237_v24, 8.507059e+37 }
 0x144   :  { %vm220_vm10 = vmor %vm218_vm9, %vm219_vm8 }
 0x145   :  { %v215_v8 = vsub.f32 1.0, %v214_v7 }
 0x147   :  { %v303_v10 = vpop.eup %302  ;;  %v216_v12 = vmul.f32 %v301_v6, %v215_v8 }
 0x148   :  { %v229_v15 = vmul.f32 %v303_v10, %v212_v5  ;;  %vm234_vm12 = vweird.f32 %v303_v10 }
 0x149   :  { %v217_v16 = vadd.f32 %v301_v6, %v216_v12  ;;  %vm235_vm14 = vmor %vm233_vm13, %vm234_vm12 }
 0x14a   :  { %v230_v17 = vsub.f32 1.0, %v229_v15 }
 0x14b   :  { %v221_v21 = vsel %vm220_vm10, %v301_v6, %v217_v16 }
 0x14c   :  { %v231_v22 = vmul.f32 %v303_v10, %v230_v17  ;;  %v226_v23 = vsel %vm223_vm11, %v225_v18, %v221_v21 }
 0x14d   :  { %v243_v26 = vmul.f32 %v226_v23, %v169_v19 }
 0x14e   :  { %v232_v27 = vadd.f32 %v303_v10, %v231_v22 }
 0x14f   :  { %245 = vst.msk [vmem:[#allocation9] sm:$0xff] %vm74_vm0, %v243_v26 }
 0x150   :  { %v236_v30 = vsel %vm235_vm14, %v303_v10, %v232_v27 }
 0x151   :  { %v241_v31 = vsel %vm238_vm15, %v240_v28, %v236_v30 }
 0x152   :  { %v244_v32 = vmul.f32 %v241_v31, %v172_v29 }
 0x154   :  { %246 = vst.msk [vmem:[#allocation9 + $0x8] sm:$0xff] %vm74_vm0, %v244_v32 }
 0x155   :  { %259 = dma.vmem_to_hbm [thread:$0]  %s252_s10, 256, %s254_s13, [#allocation5], %s407_s26, %s407_s26, %s408_s27  }
 0x156   :  { %404 = dma.done.wait [#allocation5], 256  }
 0x157   :  { %405 = vsyncadd [#allocation5], 4294967040 }
 0x158   :  { %264 = vsyncpa [#allocation4], 1 }
 0x159   :  { %265 = vsyncpa [#allocation7], 1 }
 0x15a   :  { %266 = vsyncpa [#allocation5], 1 }

</bundles_post_ra>
